<compile_context>
chip_gen: v5e
topology: v5e:2x2
jax: 0.10.0
libtpu: 0.0.40
codegen_flags: <defaults>
</compile_context>

<pallas_src>
import functools

import jax
import jax.numpy as jnp
from jax import lax
from jax.experimental import pallas as pl
from jax.experimental.pallas import tpu as pltpu


# ---------------------------------------------------------------------------
# Pallas kernels
# ---------------------------------------------------------------------------

def _ibnorm_stats_kernel(x_ref, sum_ref, ssq_ref, *, hw, tl, tps, needs_mask):
    """Pass 1: accumulate per-(split, sample, channel) sum and sum-of-squares.

    x_ref:   (1, C, TL)      tile of (N, C, HW), input dtype (f32/bf16/...).
    sum_ref: (1, 1, C, 1)    resident f32 accumulator (same block across the m axis).
    ssq_ref: (1, 1, C, 1)    resident f32 accumulator.
    """
    m = pl.program_id(2)

    @pl.when(m == 0)
    def _():
        sum_ref[...] = jnp.zeros_like(sum_ref)
        ssq_ref[...] = jnp.zeros_like(ssq_ref)

    x = x_ref[...].astype(jnp.float32)                      # (1, C, TL)
    if needs_mask:
        # Global lane position of this tile (unclamped): masks the ragged tail
        # and any fully-out-of-range steps introduced by the TensorCore split.
        start = (pl.program_id(0) * tps + m) * tl
        lane = lax.broadcasted_iota(jnp.int32, x.shape, 2) + start
        x = jnp.where(lane < hw, x, 0.0)

    sum_ref[...] += jnp.sum(x, axis=2, keepdims=True)[None]        # (1,1,C,1)
    ssq_ref[...] += jnp.sum(x * x, axis=2, keepdims=True)[None]    # (1,1,C,1)


def _ibnorm_apply_kernel(x_ref, scale_ref, bias_ref, o_ref):
    """Pass 2: y = x * scale + bias (scale/bias already fold mean, var, gamma, beta)."""
    x = x_ref[...].astype(jnp.float32)
    o_ref[...] = (x * scale_ref[...] + bias_ref[...]).astype(o_ref.dtype)


# ---------------------------------------------------------------------------
# Wrapper
# ---------------------------------------------------------------------------

def ibnorm_forward(x_nchw, gamma_bn, beta_bn, eps=1e-5,
                   max_block_bytes=2 * 1024 * 1024):
    """IBNorm forward.  x_nchw: (N, C, H, W); gamma_bn/beta_bn: (C//2,) BN affine."""
    n, c, h, w = x_nchw.shape
    cb = c // 2
    hw = h * w
    out_dtype = x_nchw.dtype
    itemsize = jnp.dtype(x_nchw.dtype).itemsize

    # NCHW-native layout: free reshape, H*W on the lane dim (always lane-dense).
    x3 = x_nchw.reshape(n, c, hw)

    # Spatial (lane) tile: ~max_block_bytes per input buffer, multiple of 128,
    # or the full H*W extent when it fits in a single block.
    tl_cap = max(128, (max_block_bytes // (c * itemsize)) // 128 * 128)
    tl = hw if hw <= tl_cap else tl_cap
    hw_tiles = pl.cdiv(hw, tl)

    # v7x second-order win: split the pass-1 reduction across 2 TensorCores when
    # the batch axis alone cannot feed both cores.  Harmless on v5e/v6e.
    split = 2 if (n == 1 and hw_tiles >= 2) else 1
    tps = pl.cdiv(hw_tiles, split)                 # tiles per split
    clamp = (split * tps) != hw_tiles              # uneven split -> duplicate last block
    needs_mask = ((hw % tl) != 0) or clamp         # ragged tail or duplicated step

    def x_stats_map(s, i, m):
        blk = s * tps + m
        if clamp:
            # Fully-out-of-range steps re-read the last block; kernel masks them to 0.
            blk = jnp.minimum(blk, hw_tiles - 1)
        return (i, 0, blk)

    acc_spec = pl.BlockSpec((1, 1, c, 1), lambda s, i, m: (s, i, 0, 0))

    stats_kernel = functools.partial(
        _ibnorm_stats_kernel, hw=hw, tl=tl, tps=tps, needs_mask=needs_mask)

    # ---- pass 1: per-(sample, channel) sum / sum-of-squares (Pallas reduction) ----
    part_sum, part_ssq = pl.pallas_call(
        stats_kernel,
        out_shape=(jax.ShapeDtypeStruct((split, n, c, 1), jnp.float32),
                   jax.ShapeDtypeStruct((split, n, c, 1), jnp.float32)),
        grid=(split, n, tps),
        in_specs=[pl.BlockSpec((1, c, tl), x_stats_map)],
        out_specs=(acc_spec, acc_spec),
        compiler_params=pltpu.CompilerParams(
            dimension_semantics=("parallel", "parallel", "arbitrary"),
            vmem_limit_bytes=32 * 1024 * 1024),
        cost_estimate=pl.CostEstimate(
            flops=3 * n * c * hw, transcendentals=0,
            bytes_accessed=n * c * hw * itemsize + 2 * split * n * c * 4),
    )(x3)

    # ---- tiny O(N*C) statistics blend, hoisted out of the kernels (plain JAX) ----
    sum_c = part_sum.sum(axis=0)[..., 0]                       # (N, C) f32
    ssq_c = part_ssq.sum(axis=0)[..., 0]                       # (N, C) f32

    cnt = jnp.float32(hw)
    mean_in = sum_c / cnt                                      # instance stats
    var_in = jnp.maximum(ssq_c / cnt - mean_in * mean_in, 0.0)
    mean_bn = sum_c.sum(axis=0) / (n * cnt)                    # batch stats (training mode)
    var_bn = jnp.maximum(ssq_c.sum(axis=0) / (n * cnt) - mean_bn * mean_bn, 0.0)

    is_bn = jnp.arange(c) < cb                                 # BN half / IN half
    mean = jnp.where(is_bn[None, :], mean_bn[None, :], mean_in)    # (N, C)
    var = jnp.where(is_bn[None, :], var_bn[None, :], var_in)       # (N, C)
    g_full = jnp.where(is_bn, jnp.pad(gamma_bn.astype(jnp.float32), (0, c - cb)), 1.0)
    b_full = jnp.where(is_bn, jnp.pad(beta_bn.astype(jnp.float32), (0, c - cb)), 0.0)

    inv = lax.rsqrt(var + eps)
    scale = g_full[None, :] * inv                              # (N, C)
    bias = b_full[None, :] - mean * scale                      # (N, C)
    scale3 = scale.reshape(n, c, 1)
    bias3 = bias.reshape(n, c, 1)

    # ---- pass 2: normalize + affine, fully parallel grid, native-dtype output ----
    y3 = pl.pallas_call(
        _ibnorm_apply_kernel,
        out_shape=jax.ShapeDtypeStruct((n, c, hw), out_dtype),
        grid=(n, hw_tiles),
        in_specs=[pl.BlockSpec((1, c, tl), lambda i, m: (i, 0, m)),
                  pl.BlockSpec((1, c, 1), lambda i, m: (i, 0, 0)),
                  pl.BlockSpec((1, c, 1), lambda i, m: (i, 0, 0))],
        out_specs=pl.BlockSpec((1, c, tl), lambda i, m: (i, 0, m)),
        compiler_params=pltpu.CompilerParams(
            dimension_semantics=("parallel", "parallel"),
            vmem_limit_bytes=32 * 1024 * 1024),
        cost_estimate=pl.CostEstimate(
            flops=2 * n * c * hw, transcendentals=0,
            bytes_accessed=2 * n * c * hw * itemsize + 2 * n * c * 4),
    )(x3, scale3, bias3)

    return y3.reshape(n, c, h, w)


# ---------------------------------------------------------------------------
# Pure-JAX reference (mirrors the PyTorch module in training mode)
# ---------------------------------------------------------------------------

def ibnorm_reference(x, gamma_bn, beta_bn, eps=1e-5):
    n, c, h, w = x.shape
    cb = c // 2
    xb = x[:, :cb]
    xi = x[:, cb:]
    mean_b = xb.mean(axis=(0, 2, 3), keepdims=True)
    var_b = xb.var(axis=(0, 2, 3), keepdims=True)             # biased, like BN training
    yb = (xb - mean_b) / jnp.sqrt(var_b + eps)
    yb = yb * gamma_bn.reshape(1, cb, 1, 1) + beta_bn.reshape(1, cb, 1, 1)
    mean_i = xi.mean(axis=(2, 3), keepdims=True)
    var_i = xi.var(axis=(2, 3), keepdims=True)                 # biased, like IN
    yi = (xi - mean_i) / jnp.sqrt(var_i + eps)
    return jnp.concatenate([yb, yi], axis=1)


# ---------------------------------------------------------------------------

if __name__ == "__main__":
    key = jax.random.PRNGKey(0)
    kx, kg, kb = jax.random.split(key, 3)

    # Config 1: small shapes consistent with the module.
    n, c, h, w = 2, 32, 16, 16
    x = jax.random.normal(kx, (n, c, h, w), jnp.float32)
    gamma = 1.0 + 0.1 * jax.random.normal(kg, (c // 2,), jnp.float32)
    beta = 0.1 * jax.random.normal(kb, (c // 2,), jnp.float32)

    out = jax.block_until_ready(jax.jit(ibnorm_forward)(x, gamma, beta))
    ref = ibnorm_reference(x, gamma, beta)
    assert out.shape == (n, c, h, w), out.shape
    assert bool(jnp.all(jnp.isfinite(out)))
    max_err = float(jnp.max(jnp.abs(out - ref)))
    assert max_err < 2e-3, max_err

    # Config 2: N=1, odd spatial extent, small forced tile -> exercises the ragged
    # tail masking, multi-tile accumulation and the 2-way TensorCore split path.
    n2, c2, h2, w2 = 1, 32, 18, 18
    x2 = jax.random.normal(kx, (n2, c2, h2, w2), jnp.float32)
    g2 = 1.0 + 0.1 * jax.random.normal(kg, (c2 // 2,), jnp.float32)
    b2 = 0.1 * jax.random.normal(kb, (c2 // 2,), jnp.float32)
    fwd_small = jax.jit(lambda a, g, b: ibnorm_forward(
        a, g, b, max_block_bytes=128 * c2 * 4))
    out2 = jax.block_until_ready(fwd_small(x2, g2, b2))
    ref2 = ibnorm_reference(x2, g2, b2)
    max_err2 = float(jnp.max(jnp.abs(out2 - ref2)))
    assert max_err2 < 2e-3, max_err2

    # Config 3: bf16 I/O path (native-dtype DMA, f32 stats, bf16 output).
    xb16 = x.astype(jnp.bfloat16)
    out3 = jax.block_until_ready(jax.jit(ibnorm_forward)(xb16, gamma, beta))
    assert out3.dtype == jnp.bfloat16
    assert bool(jnp.all(jnp.isfinite(out3.astype(jnp.float32))))
    max_err3 = float(jnp.max(jnp.abs(out3.astype(jnp.float32) - ref)))
    assert max_err3 < 5e-2, max_err3

    print("KERNEL_OK")
</pallas_src>

<mosaic_0001>
module attributes {stable_mosaic.version = 11 : i64} {
  func.func @_ibnorm_stats_kernel(%arg0: i32, %arg1: i32, %arg2: i32, %arg3: memref<1x32x256xf32, #tpu.memory_space<vmem>>, %arg4: memref<1x1x32x1xf32, #tpu.memory_space<vmem>>, %arg5: memref<1x1x32x1xf32, #tpu.memory_space<vmem>>) attributes {dimension_semantics = [#tpu.dimension_semantics<parallel>, #tpu.dimension_semantics<parallel>, #tpu.dimension_semantics<arbitrary>], iteration_bounds = array<i64: 1, 2, 1>, scalar_prefetch = 0 : i64, scratch_operands = 0 : i64, tpu.core_type = #tpu.core_type<tc>, window_params = [{transform_indices = @transform_0, window_bounds = array<i64: 1, 32, 256>}, {transform_indices = @transform_1, window_bounds = array<i64: 1, 1, 32, 1>}, {transform_indices = @transform_2, window_bounds = array<i64: 1, 1, 32, 1>}]} {
    %c0_i32 = arith.constant 0 : i32
    %0 = arith.cmpi eq, %arg2, %c0_i32 : i32
    %1 = arith.extui %0 : i1 to i32
    %c0_i32_0 = arith.constant 0 : i32
    %2 = arith.cmpi ne, %1, %c0_i32_0 : i32
    scf.if %2 {
      %cst_20 = arith.constant 0.000000e+00 : f32
      %17 = vector.broadcast %cst_20 : f32 to vector<1x1x32x1xf32>
      %c0_21 = arith.constant 0 : index
      %c0_22 = arith.constant 0 : index
      %c0_23 = arith.constant 0 : index
      %c0_24 = arith.constant 0 : index
      %18 = vector.load %arg4[%c0_21, %c0_22, %c0_23, %c0_24] : memref<1x1x32x1xf32, #tpu.memory_space<vmem>>, vector<1x1x32x1xf32>
      tpu.vector_store %arg4[%c0_21, %c0_22, %c0_23, %c0_24], %17 {strides = array<i32>} : memref<1x1x32x1xf32, #tpu.memory_space<vmem>>, vector<1x1x32x1xf32>,
      %cst_25 = arith.constant 0.000000e+00 : f32
      %19 = vector.broadcast %cst_25 : f32 to vector<1x1x32x1xf32>
      %c0_26 = arith.constant 0 : index
      %c0_27 = arith.constant 0 : index
      %c0_28 = arith.constant 0 : index
      %c0_29 = arith.constant 0 : index
      %20 = vector.load %arg5[%c0_26, %c0_27, %c0_28, %c0_29] : memref<1x1x32x1xf32, #tpu.memory_space<vmem>>, vector<1x1x32x1xf32>
      tpu.vector_store %arg5[%c0_26, %c0_27, %c0_28, %c0_29], %19 {strides = array<i32>} : memref<1x1x32x1xf32, #tpu.memory_space<vmem>>, vector<1x1x32x1xf32>,
    } else {
    }
    %c0 = arith.constant 0 : index
    %c0_1 = arith.constant 0 : index
    %c0_2 = arith.constant 0 : index
    %3 = vector.load %arg3[%c0, %c0_1, %c0_2] : memref<1x32x256xf32, #tpu.memory_space<vmem>>, vector<1x32x256xf32>
    %c0_3 = arith.constant 0 : index
    %c0_4 = arith.constant 0 : index
    %c0_5 = arith.constant 0 : index
    %c0_6 = arith.constant 0 : index
    %4 = vector.load %arg4[%c0_3, %c0_4, %c0_5, %c0_6] : memref<1x1x32x1xf32, #tpu.memory_space<vmem>>, vector<1x1x32x1xf32>
    %cst = arith.constant dense<0.000000e+00> : vector<1x32xf32>
    %5 = vector.multi_reduction <add>, %3, %cst [2] : vector<1x32x256xf32> to vector<1x32xf32>
    %6 = vector.shape_cast %5 : vector<1x32xf32> to vector<1x32x1xf32>
    %7 = vector.shape_cast %6 : vector<1x32x1xf32> to vector<1x1x32x1xf32>
    %8 = arith.addf %4, %7 : vector<1x1x32x1xf32>
    %c0_7 = arith.constant 0 : index
    %c0_8 = arith.constant 0 : index
    %c0_9 = arith.constant 0 : index
    %c0_10 = arith.constant 0 : index
    %9 = vector.load %arg4[%c0_7, %c0_8, %c0_9, %c0_10] : memref<1x1x32x1xf32, #tpu.memory_space<vmem>>, vector<1x1x32x1xf32>
    tpu.vector_store %arg4[%c0_7, %c0_8, %c0_9, %c0_10], %8 {strides = array<i32>} : memref<1x1x32x1xf32, #tpu.memory_space<vmem>>, vector<1x1x32x1xf32>,
    %c0_11 = arith.constant 0 : index
    %c0_12 = arith.constant 0 : index
    %c0_13 = arith.constant 0 : index
    %c0_14 = arith.constant 0 : index
    %10 = vector.load %arg5[%c0_11, %c0_12, %c0_13, %c0_14] : memref<1x1x32x1xf32, #tpu.memory_space<vmem>>, vector<1x1x32x1xf32>
    %11 = arith.mulf %3, %3 : vector<1x32x256xf32>
    %cst_15 = arith.constant dense<0.000000e+00> : vector<1x32xf32>
    %12 = vector.multi_reduction <add>, %11, %cst_15 [2] : vector<1x32x256xf32> to vector<1x32xf32>
    %13 = vector.shape_cast %12 : vector<1x32xf32> to vector<1x32x1xf32>
    %14 = vector.shape_cast %13 : vector<1x32x1xf32> to vector<1x1x32x1xf32>
    %15 = arith.addf %10, %14 : vector<1x1x32x1xf32>
    %c0_16 = arith.constant 0 : index
    %c0_17 = arith.constant 0 : index
    %c0_18 = arith.constant 0 : index
    %c0_19 = arith.constant 0 : index
    %16 = vector.load %arg5[%c0_16, %c0_17, %c0_18, %c0_19] : memref<1x1x32x1xf32, #tpu.memory_space<vmem>>, vector<1x1x32x1xf32>
    tpu.vector_store %arg5[%c0_16, %c0_17, %c0_18, %c0_19], %15 {strides = array<i32>} : memref<1x1x32x1xf32, #tpu.memory_space<vmem>>, vector<1x1x32x1xf32>,
    return
  }
  func.func @transform_0(%arg0: i32, %arg1: i32, %arg2: i32) -> (i32, i32, i32) {
    %c1_i32 = arith.constant 1 : i32
    %0 = arith.muli %arg0, %c1_i32 : i32
    %1 = arith.addi %0, %arg2 : i32
    %c0_i32 = arith.constant 0 : i32
    %c0_i32_0 = arith.constant 0 : i32
    return %arg1, %c0_i32, %1 : i32, i32, i32
  }
  func.func @transform_1(%arg0: i32, %arg1: i32, %arg2: i32) -> (i32, i32, i32, i32) {
    %c0_i32 = arith.constant 0 : i32
    %c0_i32_0 = arith.constant 0 : i32
    %c0_i32_1 = arith.constant 0 : i32
    return %arg0, %arg1, %c0_i32, %c0_i32_0 : i32, i32, i32, i32
  }
  func.func @transform_2(%arg0: i32, %arg1: i32, %arg2: i32) -> (i32, i32, i32, i32) {
    %c0_i32 = arith.constant 0 : i32
    %c0_i32_0 = arith.constant 0 : i32
    %c0_i32_1 = arith.constant 0 : i32
    return %arg0, %arg1, %c0_i32, %c0_i32_0 : i32, i32, i32, i32
  }
}

module attributes {stable_mosaic.version = 11 : i64} {
  func.func @_ibnorm_apply_kernel(%arg0: i32, %arg1: i32, %arg2: memref<1x32x256xf32, #tpu.memory_space<vmem>>, %arg3: memref<1x32x1xf32, #tpu.memory_space<vmem>>, %arg4: memref<1x32x1xf32, #tpu.memory_space<vmem>>, %arg5: memref<1x32x256xf32, #tpu.memory_space<vmem>>) attributes {dimension_semantics = [#tpu.dimension_semantics<parallel>, #tpu.dimension_semantics<parallel>], iteration_bounds = array<i64: 2, 1>, scalar_prefetch = 0 : i64, scratch_operands = 0 : i64, tpu.core_type = #tpu.core_type<tc>, window_params = [{transform_indices = @transform_0, window_bounds = array<i64: 1, 32, 256>}, {transform_indices = @transform_1, window_bounds = array<i64: 1, 32, 1>}, {transform_indices = @transform_2, window_bounds = array<i64: 1, 32, 1>}, {transform_indices = @transform_3, window_bounds = array<i64: 1, 32, 256>}]} {
    %c0 = arith.constant 0 : index
    %c0_0 = arith.constant 0 : index
    %c0_1 = arith.constant 0 : index
    %0 = vector.load %arg2[%c0, %c0_0, %c0_1] : memref<1x32x256xf32, #tpu.memory_space<vmem>>, vector<1x32x256xf32>
    %c0_2 = arith.constant 0 : index
    %c0_3 = arith.constant 0 : index
    %c0_4 = arith.constant 0 : index
    %1 = vector.load %arg3[%c0_2, %c0_3, %c0_4] : memref<1x32x1xf32, #tpu.memory_space<vmem>>, vector<1x32x1xf32>
    %2 = vector.broadcast %1 : vector<1x32x1xf32> to vector<1x32x256xf32>
    %3 = arith.mulf %0, %2 : vector<1x32x256xf32>
    %c0_5 = arith.constant 0 : index
    %c0_6 = arith.constant 0 : index
    %c0_7 = arith.constant 0 : index
    %4 = vector.load %arg4[%c0_5, %c0_6, %c0_7] : memref<1x32x1xf32, #tpu.memory_space<vmem>>, vector<1x32x1xf32>
    %5 = vector.broadcast %4 : vector<1x32x1xf32> to vector<1x32x256xf32>
    %6 = arith.addf %3, %5 : vector<1x32x256xf32>
    %c0_8 = arith.constant 0 : index
    %c0_9 = arith.constant 0 : index
    %c0_10 = arith.constant 0 : index
    %7 = vector.load %arg5[%c0_8, %c0_9, %c0_10] : memref<1x32x256xf32, #tpu.memory_space<vmem>>, vector<1x32x256xf32>
    tpu.vector_store %arg5[%c0_8, %c0_9, %c0_10], %6 {strides = array<i32>} : memref<1x32x256xf32, #tpu.memory_space<vmem>>, vector<1x32x256xf32>,
    return
  }
  func.func @transform_0(%arg0: i32, %arg1: i32) -> (i32, i32, i32) {
    %c0_i32 = arith.constant 0 : i32
    %c0_i32_0 = arith.constant 0 : i32
    return %arg0, %c0_i32, %arg1 : i32, i32, i32
  }
  func.func @transform_1(%arg0: i32, %arg1: i32) -> (i32, i32, i32) {
    %c0_i32 = arith.constant 0 : i32
    %c0_i32_0 = arith.constant 0 : i32
    %c0_i32_1 = arith.constant 0 : i32
    return %arg0, %c0_i32, %c0_i32_0 : i32, i32, i32
  }
  func.func @transform_2(%arg0: i32, %arg1: i32) -> (i32, i32, i32) {
    %c0_i32 = arith.constant 0 : i32
    %c0_i32_0 = arith.constant 0 : i32
    %c0_i32_1 = arith.constant 0 : i32
    return %arg0, %c0_i32, %c0_i32_0 : i32, i32, i32
  }
  func.func @transform_3(%arg0: i32, %arg1: i32) -> (i32, i32, i32) {
    %c0_i32 = arith.constant 0 : i32
    %c0_i32_0 = arith.constant 0 : i32
    return %arg0, %c0_i32, %arg1 : i32, i32, i32
  }
}

</mosaic_0001>

<bundles_post_ra>
// kernel: ibnorm_forward.2
= control target key start
LH: loop header
LB: loop body
LE: loop exit
PB: predicated region body
PF: predicated region fallthrough
CT: control target
= control target key end

     0   :  { %s523_s9 = smov 0   ;;  %s525_s10 = smov 0   ;;  %s603_s0 = inlined_call_operand.vmem [shape: f32[2,32,256], index: 0, kind: input, shape index: {}]   ;;  %s604_s1 = inlined_call_operand.vmem [shape: f32[1,2,32,1], index: 1, kind: output, shape index: {0}]   ;;  %s605_s2 = inlined_call_operand.vmem [shape: f32[1,2,32,1], index: 2, kind: output, shape index: {1}]  }
   0x1   :  { %s527_s11 = smov 0  }
   0x2 LB: > { %s28_s12 = sadd.s32 1, %s501_s10  ;;  %p446_p0 = scmp.ge.s32.totalorder %s505_s11, 1  ;;  %s505_s11 = sphi %s527_s11, %s13_s11   ;;  %s501_s10 = sphi %s525_s10, %s607_s10   ;;  %s497_s9 = sphi %s523_s9, %s606_s9  }
   0x3   : > { %p30_p1 = scmp.ge.s32.totalorder %s28_s12, 2  ;;  %p149_p2 = scmp.lt.s32.totalorder %s505_s11, 3 }
   0x5   : > { %s609_s12 = smov (%p30_p1, %s28_s12), 0  ;;  %p150_p3 = pnand %p446_p0, %p149_p2 }
   0x6   : > { %p191_p4 = scmp.lt.s32.totalorder (!%p150_p3), %s497_s9, 1 }
   0x7   : > { %153 = sbr.rel (%p150_p3) target bundleno = 154 (0x9a), region = 24 }
   0xc   : > { %s611_s9 = smov (!%p191_p4, %s497_s9), 1  ;;  %vm223_vm0 = vcmask 7168   ;;  %v507_v3 = vmov 0.0  }
   0xd   : > { %s455_s13 = sshll.u32 %s611_s9, 6  ;;  %s456_s14 = sshll.u32 %s611_s9, 5 }
   0xe   : > { %s198_s17 = scalar_lea.vmem %s603_s0, %s455_s13  ;;  %s547_s20 = scalar_lea.vmem %s604_s1, %s456_s14 }
   0xf   : > { %v236_v0 = vld [vmem:[%s198_s17 + $0x20] sm:$0xff]  ;;  %v237_v1 = vld [vmem:[%s198_s17 + $0x28] sm:$0xff]  ;;  %226 = vst.msk [vmem:[%s547_s20 + $0x10] sm:$0xff] %vm223_vm0, %v507_v3  ;;  %s556_s23 = scalar_lea.vmem %s605_s2, %s456_s14  ;;  %v238_v9 = vld [vmem:[%s198_s17 + $0x30] sm:$0xff] }
  0x10   : > { %v232_v2 = vld [vmem:[%s198_s17] sm:$0xff]  ;;  %v250_v4 = vadd.f32 %v237_v1, %v236_v0  ;;  %v233_v5 = vld [vmem:[%s198_s17 + $0x8] sm:$0xff]  ;;  %224 = vst.msk [vmem:[%s547_s20] sm:$0xff] %vm223_vm0, %v507_v3  ;;  %v239_v10 = vld [vmem:[%s198_s17 + $0x38] sm:$0xff]  ;;  %v275_v19 = vmul.f32 %v238_v9, %v238_v9  ;;  %v273_v21 = vmul.f32 %v236_v0, %v236_v0  ;;  %v274_v22 = vmul.f32 %v237_v1, %v237_v1 }
  0x11   : > { %v269_v6 = vmul.f32 %v232_v2, %v232_v2  ;;  %v244_v7 = vadd.f32 %v233_v5, %v232_v2  ;;  %v270_v8 = vmul.f32 %v233_v5, %v233_v5  ;;  %225 = vst.msk [vmem:[%s547_s20 + $0x8] sm:$0xff] %vm223_vm0, %v507_v3  ;;  %v234_v12 = vld [vmem:[%s198_s17 + $0x10] sm:$0xff]  ;;  %v235_v13 = vld [vmem:[%s198_s17 + $0x18] sm:$0xff]  ;;  %v253_v16 = vadd.f32 %v239_v10, %v238_v9 }
  0x12   : > { %251 = vadd.xlane.f32.xlu1 %v250_v4  ;;  %227 = vst.msk [vmem:[%s547_s20 + $0x18] sm:$0xff] %vm223_vm0, %v507_v3  ;;  %v271_v14 = vmul.f32 %v234_v12, %v234_v12  ;;  %v272_v15 = vmul.f32 %v235_v13, %v235_v13  ;;  %v247_v17 = vadd.f32 %v235_v13, %v234_v12 }
  0x13   : > { %245 = vadd.xlane.f32.xlu0 %v244_v7  ;;  %v277_v11 = vadd.f32 %v270_v8, %v269_v6  ;;  %228 = vst.msk [vmem:[%s556_s23] sm:$0xff] %vm223_vm0, %v507_v3  ;;  %v276_v20 = vmul.f32 %v239_v10, %v239_v10  ;;  %v283_v24 = vadd.f32 %v274_v22, %v273_v21 }
  0x14   : > { %229 = vst.msk [vmem:[%s556_s23 + $0x8] sm:$0xff] %vm223_vm0, %v507_v3  ;;  %v280_v18 = vadd.f32 %v272_v15, %v271_v14 }
  0x15   : > { %278 = vadd.xlane.f32.xlu2 %v277_v11  ;;  %230 = vst.msk [vmem:[%s556_s23 + $0x10] sm:$0xff] %vm223_vm0, %v507_v3  ;;  %v286_v23 = vadd.f32 %v276_v20, %v275_v19 }
  0x16   : > { %231 = vst.msk [vmem:[%s556_s23 + $0x18] sm:$0xff] %vm223_vm0, %v507_v3  ;;  %v242_v25 = vld [vmem:[%s547_s20 + $0x10] sm:$0xff] }
  0x17   : > { %v240_v26 = vld [vmem:[%s547_s20] sm:$0xff] }
  0x18   : > { %v241_v35 = vld [vmem:[%s547_s20 + $0x8] sm:$0xff] }
  0x19   : > { %v243_v34 = vld [vmem:[%s547_s20 + $0x18] sm:$0xff] }
  0x1a   : > { %254 = vadd.xlane.f32.xlu1 %v253_v16  ;;  %v265_v30 = vld [vmem:[%s556_s23] sm:$0xff] }
  0x1b   : > { %248 = vadd.xlane.f32.xlu0 %v247_v17  ;;  %v266_v39 = vld [vmem:[%s556_s23 + $0x8] sm:$0xff] }
  0x1c   : > { %v267_v44 = vld [vmem:[%s556_s23 + $0x10] sm:$0xff] }
  0x1d   : > { %281 = vadd.xlane.f32.xlu2 %v280_v18  ;;  %v268_v43 = vld [vmem:[%s556_s23 + $0x18] sm:$0xff] }
  0x22   : > { %287 = vadd.xlane.f32.xlu1 %v286_v23 }
  0x23   : > { %284 = vadd.xlane.f32.xlu0 %v283_v24 }
  0x85   : > { %v252_v27 = vpop.xlane.xlu1 %251 }
  0x86   : > { %v258_v28 = vadd.f32 %v252_v27, %v242_v25  ;;  %v246_v29 = vpop.xlane.xlu0 %245 }
  0x87   : > { %v256_v31 = vadd.f32 %v246_v29, %v240_v26 }
  0x88   : > { %263 = vst.msk [vmem:[%s547_s20 + $0x10] sm:$0xff] %vm223_vm0, %v258_v28  ;;  %v279_v32 = vpop.xlane.xlu2 %278 }
  0x89   : > { %261 = vst.msk [vmem:[%s547_s20] sm:$0xff] %vm223_vm0, %v256_v31  ;;  %v289_v33 = vadd.f32 %v279_v32, %v265_v30 }
  0x8b   : > { %293 = vst.msk [vmem:[%s556_s23] sm:$0xff] %vm223_vm0, %v289_v33 }
  0x8d   : > { %v255_v36 = vpop.xlane.xlu1 %254 }
  0x8e   : > { %v259_v37 = vadd.f32 %v255_v36, %v243_v34  ;;  %v249_v38 = vpop.xlane.xlu0 %248 }
  0x8f   : > { %v257_v40 = vadd.f32 %v249_v38, %v241_v35 }
  0x90   : > { %264 = vst.msk [vmem:[%s547_s20 + $0x18] sm:$0xff] %vm223_vm0, %v259_v37  ;;  %v282_v41 = vpop.xlane.xlu2 %281 }
  0x91   : > { %262 = vst.msk [vmem:[%s547_s20 + $0x8] sm:$0xff] %vm223_vm0, %v257_v40  ;;  %v290_v42 = vadd.f32 %v282_v41, %v266_v39 }
  0x93   : > { %294 = vst.msk [vmem:[%s556_s23 + $0x8] sm:$0xff] %vm223_vm0, %v290_v42 }
  0x95   : > { %v288_v45 = vpop.xlane.xlu1 %287 }
  0x96   : > { %v292_v46 = vadd.f32 %v288_v45, %v268_v43  ;;  %v285_v47 = vpop.xlane.xlu0 %284 }
  0x97   : > { %v291_v48 = vadd.f32 %v285_v47, %v267_v44 }
  0x98   : > { %296 = vst.msk [vmem:[%s556_s23 + $0x18] sm:$0xff] %vm223_vm0, %v292_v46 }
  0x99   : > { %295 = vst.msk [vmem:[%s556_s23 + $0x10] sm:$0xff] %vm223_vm0, %v291_v48 }
  0x9a PF: > { %s13_s11 = sadd.s32 1, %s505_s11   ;;  %s606_s9 = smov %s501_s10 }
  0x9b   : > { %p10_p5 = scmp.ge.s32.totalorder %s13_s11, 4   ;;  %s607_s10 = smov %s609_s12 }
  0x9d   :  { %12 = sbr.rel (!%p10_p5) target bundleno = 2 (0x2), region = 70 }

// kernel: ibnorm_forward.3
= control target key start
LH: loop header
LB: loop body
LE: loop exit
PB: predicated region body
PF: predicated region fallthrough
CT: control target
= control target key end

     0   :  { %s533_s12 = smov 0   ;;  %s535_s13 = smov 0   ;;  %s586_s0 = inlined_call_operand.vmem [shape: f32[2,32,256], index: 0, kind: input, shape index: {}]   ;;  %s587_s1 = inlined_call_operand.vmem [shape: f32[2,32,1], index: 1, kind: input, shape index: {}]   ;;  %s588_s2 = inlined_call_operand.vmem [shape: f32[2,32,1], index: 2, kind: input, shape index: {}]   ;;  %s589_s3 = inlined_call_operand.vmem [shape: f32[2,32,256], index: 3, kind: output, shape index: {}]  }
   0x1   :  { %s537_s14 = smov 0  }
   0x2 LB: > { %s25_s15 = sadd.s32 1, %s506_s13  ;;  %p445_p0 = scmp.ge.s32.totalorder %s510_s14, 1  ;;  %s510_s14 = sphi %s537_s14, %s13_s14   ;;  %s506_s13 = sphi %s535_s13, %s591_s13   ;;  %s502_s12 = sphi %s533_s12, %s590_s12  }
   0x3   : > { %p27_p1 = scmp.ge.s32.totalorder %s25_s15, 2  ;;  %p178_p2 = scmp.lt.s32.totalorder %s510_s14, 3 }
   0x5   : > { %s593_s15 = smov (%p27_p1, %s25_s15), 0  ;;  %p179_p3 = pnand %p445_p0, %p178_p2 }
   0x6   : > { %p221_p4 = scmp.lt.s32.totalorder (!%p179_p3), %s502_s12, 1 }
   0x7   : > { %182 = sbr.rel (%p179_p3) target bundleno = 153 (0x99), region = 32 }
   0xc   : > { %v512_v0 = vmov 0   ;;  %s595_s12 = smov (!%p221_p4, %s502_s12), 1 }
   0xd   : > { %486 = vset.pattern.permute.xlu1 %v512_v0  ;;  %485 = vset.pattern.permute.xlu0 %v512_v0  ;;  %s457_s16 = sshll.u32 %s595_s12, 5  ;;  %s456_s23 = sshll.u32 %s595_s12, 6 }
   0xe   : > { %487 = vset.pattern.permute.xlu2 %v512_v0  ;;  %s234_s19 = scalar_lea.vmem %s587_s1, %s457_s16  ;;  %s239_s22 = scalar_lea.vmem %s588_s2, %s457_s16 }
   0xf   : > { %v260_v1 = vld [vmem:[%s234_s19 + $0x10] sm:$0xff]  ;;  %v258_v2 = vld [vmem:[%s234_s19] sm:$0xff]  ;;  %v261_v4 = vld [vmem:[%s234_s19 + $0x18] sm:$0xff]  ;;  %s228_s26 = scalar_lea.vmem %s586_s0, %s456_s23  ;;  %s567_s29 = scalar_lea.vmem %s589_s3, %s456_s23 }
  0x10   : > { %274 = vperm.xlu1 %486, %v260_v1   ;;  %264 = vperm.xlu0 %485, %v258_v2   ;;  %v290_v3 = vld [vmem:[%s239_s22] sm:$0xff]  ;;  %v259_v5 = vld [vmem:[%s234_s19 + $0x8] sm:$0xff]  ;;  %v293_v7 = vld [vmem:[%s239_s22 + $0x18] sm:$0xff] }
  0x11   : > { %296 = vperm.xlu2 %487, %v290_v3   ;;  %v291_v6 = vld [vmem:[%s239_s22 + $0x8] sm:$0xff]  ;;  %v292_v8 = vld [vmem:[%s239_s22 + $0x10] sm:$0xff]  ;;  %v250_v9 = vld [vmem:[%s228_s26] sm:$0xff] }
  0x12   : > { %v251_v10 = vld [vmem:[%s228_s26 + $0x8] sm:$0xff]  ;;  %v252_v18 = vld [vmem:[%s228_s26 + $0x10] sm:$0xff]  ;;  %v253_v19 = vld [vmem:[%s228_s26 + $0x18] sm:$0xff] }
  0x13   : > { %v254_v27 = vld [vmem:[%s228_s26 + $0x20] sm:$0xff]  ;;  %v256_v28 = vld [vmem:[%s228_s26 + $0x30] sm:$0xff]  ;;  %v257_v29 = vld [vmem:[%s228_s26 + $0x38] sm:$0xff] }
  0x14   : > { %v255_v30 = vld [vmem:[%s228_s26 + $0x28] sm:$0xff] }
  0x18   : > { %279 = vperm.xlu1 %486, %v261_v4   ;;  %269 = vperm.xlu0 %485, %v259_v5  }
  0x19   : > { %301 = vperm.xlu2 %487, %v291_v6  }
  0x20   : > { %311 = vperm.xlu1 %486, %v293_v7   ;;  %306 = vperm.xlu0 %485, %v292_v8  }
  0x6b   : > { %v297_v11 = vpop.permute.xlu2 %296 }
  0x73   : > { %v302_v24 = vpop.permute.xlu2 %301 }
  0x82   : > { %v275_v12 = vpop.permute.xlu1 %274  ;;  %v265_v13 = vpop.permute.xlu0 %264 }
  0x83   : > { %v282_v14 = vmul.f32 %v265_v13, %v250_v9  ;;  %v283_v15 = vmul.f32 %v265_v13, %v251_v10  ;;  %v286_v31 = vmul.f32 %v275_v12, %v254_v27  ;;  %v287_v34 = vmul.f32 %v275_v12, %v255_v30 }
  0x85   : > { %v314_v16 = vadd.f32 %v297_v11, %v282_v14  ;;  %v315_v17 = vadd.f32 %v297_v11, %v283_v15 }
  0x87   : > { %322 = vst [vmem:[%s567_s29] sm:$0xff] %v314_v16 }
  0x88   : > { %323 = vst [vmem:[%s567_s29 + $0x8] sm:$0xff] %v315_v17 }
  0x8a   : > { %v280_v20 = vpop.permute.xlu1 %279  ;;  %v270_v21 = vpop.permute.xlu0 %269 }
  0x8b   : > { %v284_v22 = vmul.f32 %v270_v21, %v252_v18  ;;  %v285_v23 = vmul.f32 %v270_v21, %v253_v19  ;;  %v288_v32 = vmul.f32 %v280_v20, %v256_v28  ;;  %v289_v33 = vmul.f32 %v280_v20, %v257_v29 }
  0x8d   : > { %v316_v25 = vadd.f32 %v302_v24, %v284_v22  ;;  %v317_v26 = vadd.f32 %v302_v24, %v285_v23 }
  0x8f   : > { %324 = vst [vmem:[%s567_s29 + $0x10] sm:$0xff] %v316_v25 }
  0x90   : > { %325 = vst [vmem:[%s567_s29 + $0x18] sm:$0xff] %v317_v26 }
  0x92   : > { %v312_v35 = vpop.permute.xlu1 %311  ;;  %v307_v36 = vpop.permute.xlu0 %306 }
  0x93   : > { %v320_v37 = vadd.f32 %v312_v35, %v288_v32  ;;  %v321_v38 = vadd.f32 %v312_v35, %v289_v33  ;;  %v318_v39 = vadd.f32 %v307_v36, %v286_v31  ;;  %v319_v40 = vadd.f32 %v307_v36, %v287_v34 }
  0x95   : > { %328 = vst [vmem:[%s567_s29 + $0x30] sm:$0xff] %v320_v37 }
  0x96   : > { %329 = vst [vmem:[%s567_s29 + $0x38] sm:$0xff] %v321_v38 }
  0x97   : > { %326 = vst [vmem:[%s567_s29 + $0x20] sm:$0xff] %v318_v39 }
  0x98   : > { %327 = vst [vmem:[%s567_s29 + $0x28] sm:$0xff] %v319_v40 }
  0x99 PF: > { %s13_s14 = sadd.s32 1, %s510_s14   ;;  %s590_s12 = smov %s506_s13 }
  0x9a   : > { %p10_p5 = scmp.ge.s32.totalorder %s13_s14, 4   ;;  %s591_s13 = smov %s593_s15 }
  0x9c   :  { %12 = sbr.rel (!%p10_p5) target bundleno = 2 (0x2), region = 68 }

</bundles_post_ra>
